<compile_context>
chip_gen: v7x
topology: tpu7x:2x2x1
jax: 0.10.0
libtpu: 0.0.40
codegen_flags: <defaults>
</compile_context>

<pallas_src>
import jax
import jax.numpy as jnp
from jax.experimental import pallas as pl
from jax.experimental.pallas import tpu as pltpu

# ---------------------------------------------------------------------------
# Config (small shapes, consistent with the module's defaults scaled down)
# ---------------------------------------------------------------------------
NUM_MODALITIES = 3               # num_modalities
B = 8                            # batch
D_FEAT = 16                      # per-modality feature dim
HIDDEN = 32                      # hidden_dim (scaled down from 256)
C_OUT = 8                        # fusion output / logits dim
D_IN = NUM_MODALITIES * D_FEAT   # concatenated feature dim (48)
N_BRANCH = NUM_MODALITIES + 1    # anchor + one perturbed branch per modality (4)

_NORM_EPS = 1e-12                # torch.nn.functional.normalize default eps

# Augmented-layout constants
_ONES_COL = N_BRANCH * HIDDEN          # 128: constant-1 carrier column of layer-1 output
_GATE_COL = N_BRANCH * HIDDEN + 1      # 129: gate-logit column (not ReLU'd)
_W1_COLS = N_BRANCH * HIDDEN + 2       # 130: branch blocks + ones carrier + gate
_H_L2 = N_BRANCH * HIDDEN + 1          # 129: layer-2 contraction dim (branches + carrier)
_W2_COLS = 128                         # lane-dense layer-2 / output width
_ILOSS_COL = N_BRANCH * C_OUT          # 32: interaction loss lane in the output slab
_GLOSS_COL = N_BRANCH * C_OUT + 1      # 33: gate loss lane in the output slab


# ---------------------------------------------------------------------------
# Fused kernel: fusion MLP (anchor + perturbed branches) + redundancy loss
#               + (stand-in) sparse gate loss, single grid-less invocation.
# ---------------------------------------------------------------------------
def _fused_expert_kernel(x_ref, w1_ref, w2_ref, out_ref):
    xa = x_ref[...]          # (B, D_IN+1)   last column == 1 (bias carrier)
    w1a = w1_ref[...]        # (D_IN+1, 130)
    w2a = w2_ref[...]        # (129, 128)    block-diag W2, last row = tiled b2

    # ---- layer 1 + all zeroed-modality branches + gate in ONE MXU pass -----
    big = jnp.dot(xa, w1a, preferred_element_type=jnp.float32)      # (B, 130)
    gate_logit = big[:, _GATE_COL:_GATE_COL + 1]                    # (B, 1), pre-ReLU
    h = jnp.maximum(big[:, :_H_L2], 0.0)                            # (B, 129); carrier stays 1

    # ---- layer 2 for all branches in ONE MXU pass (bias via carrier row) ---
    out_full = jnp.dot(h, w2a, preferred_element_type=jnp.float32)  # (B, 128)

    # Single lane-dense, unmasked store of the whole slab.
    out_ref[...] = out_full.astype(out_ref.dtype)

    # ---- redundancy loss (torch F.normalize(p=2, dim=1, eps=1e-12)) --------
    eps_sq = _NORM_EPS * _NORM_EPS

    def _l2_normalize(v):
        return v * jax.lax.rsqrt(
            jnp.maximum(jnp.sum(v * v, axis=-1, keepdims=True), eps_sq))

    a_n = _l2_normalize(out_full[:, 0:C_OUT])                       # anchor, normalized once
    loss_sum = 0.0
    for m in range(1, N_BRANCH):                                    # trace-time unrolled
        p_n = _l2_normalize(out_full[:, m * C_OUT:(m + 1) * C_OUT])
        cos = jnp.sum(a_n * p_n, axis=-1, keepdims=True)            # (B, 1)
        loss_sum = loss_sum + jnp.mean(1.0 - cos)
    iloss = loss_sum / NUM_MODALITIES

    # TODO(synk): the sparse-gating loss of InteractionExpert is not defined in the
    # provided source; deterministic synthetic stand-in (sigmoid gate, mean of squares).
    gate = jax.nn.sigmoid(gate_logit)                               # (B, 1)
    gloss = jnp.mean(gate * gate)

    # Losses occupy fixed lanes of the same output slab (one output buffer, one DMA).
    out_ref[0:1, _ILOSS_COL:_ILOSS_COL + 1] = iloss.reshape(1, 1)
    out_ref[0:1, _GLOSS_COL:_GLOSS_COL + 1] = gloss.reshape(1, 1)


def fused_single_interaction_expert(x_aug, w1_aug, w2_aug):
    """x_aug: [B, D_IN+1] (last col = 1). Returns (logits, interaction_loss, gate_loss)."""
    b = x_aug.shape[0]
    vmem = pl.BlockSpec(memory_space=pltpu.MemorySpace.VMEM)
    cost = pl.CostEstimate(
        flops=2 * b * (D_IN + 1) * _W1_COLS
              + 2 * b * _H_L2 * _W2_COLS
              + 8 * b * N_BRANCH * C_OUT,
        transcendentals=b * (1 + N_BRANCH),          # sigmoid + per-branch rsqrt
        bytes_accessed=4 * (x_aug.size + w1_aug.size + w2_aug.size + b * _W2_COLS),
    )
    slab = pl.pallas_call(
        _fused_expert_kernel,
        out_shape=jax.ShapeDtypeStruct((b, _W2_COLS), jnp.float32),
        in_specs=[vmem, vmem, vmem],
        out_specs=vmem,
        cost_estimate=cost,
    )(x_aug, w1_aug, w2_aug)
    logits = slab[:, :C_OUT]
    return logits, slab[0, _ILOSS_COL], slab[0, _GLOSS_COL]


# ---------------------------------------------------------------------------
# Wrapper-side packing of inputs / parameters into the augmented layout
# ---------------------------------------------------------------------------
def _pack_x(x_full):
    b = x_full.shape[0]
    ones = jnp.ones((b, 1), x_full.dtype)
    return jnp.concatenate([x_full, ones], axis=1)                  # (B, D_IN+1)


def _pack_weights(w1, b1, w2, b2, gate_w):
    # --- layer-1 augmented weight: (D_IN+1, 130) -----------------------------
    idx = jnp.arange(D_IN)
    blocks = [jnp.concatenate([w1, b1], axis=0)]                    # anchor: full W1 + bias
    for m in range(NUM_MODALITIES):
        lo, hi = m * D_FEAT, (m + 1) * D_FEAT
        keep = ((idx < lo) | (idx >= hi)).astype(w1.dtype)[:, None]
        blocks.append(jnp.concatenate([w1 * keep, b1], axis=0))     # modality m zeroed
    ones_col = jnp.concatenate(
        [jnp.zeros((D_IN, 1), w1.dtype), jnp.ones((1, 1), w1.dtype)], axis=0)
    gate_col = jnp.concatenate([gate_w.T, jnp.zeros((1, 1), w1.dtype)], axis=0)
    w1_aug = jnp.concatenate(blocks + [ones_col, gate_col], axis=1)  # (49, 130)

    # --- layer-2 augmented weight: block-diag W2 + tiled b2 row, padded ------
    w2_aug = jnp.zeros((N_BRANCH * HIDDEN + 1, _W2_COLS), w2.dtype)  # (129, 128)
    for n in range(N_BRANCH):
        w2_aug = w2_aug.at[n * HIDDEN:(n + 1) * HIDDEN,
                           n * C_OUT:(n + 1) * C_OUT].set(w2)
        w2_aug = w2_aug.at[N_BRANCH * HIDDEN,
                           n * C_OUT:(n + 1) * C_OUT].set(b2[0])
    return w1_aug, w2_aug


# ---------------------------------------------------------------------------
# SingleInterctionExpert forward (fusion_sparse=True, type_of_interaction='red')
# ---------------------------------------------------------------------------
def make_params(key):
    k1, k2, k3, k4, k5 = jax.random.split(key, 5)
    w1 = jax.random.normal(k1, (D_IN, HIDDEN), jnp.float32) * 0.1
    b1 = jax.random.normal(k2, (1, HIDDEN), jnp.float32) * 0.01
    w2 = jax.random.normal(k3, (HIDDEN, C_OUT), jnp.float32) * 0.1
    b2 = jax.random.normal(k4, (1, C_OUT), jnp.float32) * 0.01
    gate_w = jax.random.normal(k5, (1, D_IN), jnp.float32) * 0.1
    return dict(w1=w1, b1=b1, w2=w2, b2=b2, gate_w=gate_w)


def single_interaction_expert_forward(params, inputs):
    """inputs: list of NUM_MODALITIES arrays, each [B, D_FEAT].
    Returns (logits, interaction_loss, expert_gate_loss)."""
    x_full = jnp.concatenate(inputs, axis=1)                        # [B, D_IN]
    x_aug = _pack_x(x_full)
    w1_aug, w2_aug = _pack_weights(params["w1"], params["b1"], params["w2"],
                                   params["b2"], params["gate_w"])
    return fused_single_interaction_expert(x_aug, w1_aug, w2_aug)


if __name__ == "__main__":
    key = jax.random.PRNGKey(0)
    pkey, *ikeys = jax.random.split(key, 1 + NUM_MODALITIES)
    params = make_params(pkey)
    inputs = [jax.random.normal(k, (B, D_FEAT), jnp.float32) for k in ikeys]

    logits, interaction_loss, gate_loss = single_interaction_expert_forward(params, inputs)
    jax.block_until_ready((logits, interaction_loss, gate_loss))

    assert logits.shape == (B, C_OUT)
    assert interaction_loss.shape == ()
    assert gate_loss.shape == ()
    print("KERNEL_OK")
</pallas_src>

<mosaic_0001>
module attributes {stable_mosaic.version = 11 : i64} {
  func.func @_fused_expert_kernel(%arg0: memref<8x49xf32, #tpu.memory_space<vmem>>, %arg1: memref<49x130xf32, #tpu.memory_space<vmem>>, %arg2: memref<129x128xf32, #tpu.memory_space<vmem>>, %arg3: memref<8x128xf32, #tpu.memory_space<vmem>>) attributes {dimension_semantics = [], scalar_prefetch = 0 : i64, scratch_operands = 0 : i64, tpu.core_type = #tpu.core_type<tc>} {
    %c0 = arith.constant 0 : index
    %c0_0 = arith.constant 0 : index
    %0 = vector.load %arg0[%c0, %c0_0] : memref<8x49xf32, #tpu.memory_space<vmem>>, vector<8x49xf32>
    %c0_1 = arith.constant 0 : index
    %c0_2 = arith.constant 0 : index
    %1 = vector.load %arg1[%c0_1, %c0_2] : memref<49x130xf32, #tpu.memory_space<vmem>>, vector<49x130xf32>
    %c0_3 = arith.constant 0 : index
    %c0_4 = arith.constant 0 : index
    %2 = vector.load %arg2[%c0_3, %c0_4] : memref<129x128xf32, #tpu.memory_space<vmem>>, vector<129x128xf32>
    %cst = arith.constant dense<0.000000e+00> : vector<8x130xf32>
    %3 = tpu.matmul %0, %1, %cst {dimension_numbers = #tpu.dot_dimension_numbers<[1], [0], [0], [1], [0, 0, 1, 1], [], []>} : vector<8x49xf32>, vector<49x130xf32>, vector<8x130xf32> -> vector<8x130xf32>
    %4 = vector.extract_strided_slice %3 {offsets = [0, 129], sizes = [8, 1], strides = [1, 1]} : vector<8x130xf32> to vector<8x1xf32>
    %5 = vector.extract_strided_slice %3 {offsets = [0, 0], sizes = [8, 129], strides = [1, 1]} : vector<8x130xf32> to vector<8x129xf32>
    %cst_5 = arith.constant 0.000000e+00 : f32
    %6 = vector.broadcast %cst_5 : f32 to vector<8x129xf32>
    %7 = arith.maximumf %5, %6 : vector<8x129xf32>
    %cst_6 = arith.constant dense<0.000000e+00> : vector<8x128xf32>
    %8 = tpu.matmul %7, %2, %cst_6 {dimension_numbers = #tpu.dot_dimension_numbers<[1], [0], [0], [1], [0, 0, 1, 1], [], []>} : vector<8x129xf32>, vector<129x128xf32>, vector<8x128xf32> -> vector<8x128xf32>
    %c0_7 = arith.constant 0 : index
    %c0_8 = arith.constant 0 : index
    %9 = vector.load %arg3[%c0_7, %c0_8] : memref<8x128xf32, #tpu.memory_space<vmem>>, vector<8x128xf32>
    tpu.vector_store %arg3[%c0_7, %c0_8], %8 {strides = array<i32>} : memref<8x128xf32, #tpu.memory_space<vmem>>, vector<8x128xf32>,
    %10 = vector.extract_strided_slice %8 {offsets = [0, 0], sizes = [8, 8], strides = [1, 1]} : vector<8x128xf32> to vector<8x8xf32>
    %11 = arith.mulf %10, %10 : vector<8x8xf32>
    %cst_9 = arith.constant dense<0.000000e+00> : vector<8xf32>
    %12 = vector.multi_reduction <add>, %11, %cst_9 [1] : vector<8x8xf32> to vector<8xf32>
    %13 = vector.shape_cast %12 : vector<8xf32> to vector<8x1xf32>
    %cst_10 = arith.constant 1.000000e-24 : f32
    %14 = vector.broadcast %cst_10 : f32 to vector<8x1xf32>
    %15 = arith.maximumf %13, %14 : vector<8x1xf32>
    %16 = math.rsqrt %15 : vector<8x1xf32>
    %17 = vector.broadcast %16 : vector<8x1xf32> to vector<8x8xf32>
    %18 = arith.mulf %10, %17 : vector<8x8xf32>
    %19 = vector.extract_strided_slice %8 {offsets = [0, 8], sizes = [8, 8], strides = [1, 1]} : vector<8x128xf32> to vector<8x8xf32>
    %20 = arith.mulf %19, %19 : vector<8x8xf32>
    %cst_11 = arith.constant dense<0.000000e+00> : vector<8xf32>
    %21 = vector.multi_reduction <add>, %20, %cst_11 [1] : vector<8x8xf32> to vector<8xf32>
    %22 = vector.shape_cast %21 : vector<8xf32> to vector<8x1xf32>
    %cst_12 = arith.constant 1.000000e-24 : f32
    %23 = vector.broadcast %cst_12 : f32 to vector<8x1xf32>
    %24 = arith.maximumf %22, %23 : vector<8x1xf32>
    %25 = math.rsqrt %24 : vector<8x1xf32>
    %26 = vector.broadcast %25 : vector<8x1xf32> to vector<8x8xf32>
    %27 = arith.mulf %19, %26 : vector<8x8xf32>
    %28 = arith.mulf %18, %27 : vector<8x8xf32>
    %cst_13 = arith.constant dense<0.000000e+00> : vector<8xf32>
    %29 = vector.multi_reduction <add>, %28, %cst_13 [1] : vector<8x8xf32> to vector<8xf32>
    %30 = vector.shape_cast %29 : vector<8xf32> to vector<8x1xf32>
    %cst_14 = arith.constant 1.000000e+00 : f32
    %31 = vector.broadcast %cst_14 : f32 to vector<8x1xf32>
    %32 = arith.subf %31, %30 : vector<8x1xf32>
    %33 = vector.shape_cast %32 : vector<8x1xf32> to vector<1x8x1xf32>
    %cst_15 = arith.constant dense<0.000000e+00> : vector<1xf32>
    %34 = vector.multi_reduction <add>, %33, %cst_15 [1, 2] : vector<1x8x1xf32> to vector<1xf32>
    %35 = vector.shape_cast %34 : vector<1xf32> to vector<1x1x1xf32>
    %36 = vector.extract %35[0, 0, 0] : f32 from vector<1x1x1xf32>
    %cst_16 = arith.constant 8.000000e+00 : f32
    %37 = arith.divf %36, %cst_16 : f32
    %cst_17 = arith.constant 0.000000e+00 : f32
    %38 = arith.addf %cst_17, %37 : f32
    %39 = vector.extract_strided_slice %8 {offsets = [0, 16], sizes = [8, 8], strides = [1, 1]} : vector<8x128xf32> to vector<8x8xf32>
    %40 = arith.mulf %39, %39 : vector<8x8xf32>
    %cst_18 = arith.constant dense<0.000000e+00> : vector<8xf32>
    %41 = vector.multi_reduction <add>, %40, %cst_18 [1] : vector<8x8xf32> to vector<8xf32>
    %42 = vector.shape_cast %41 : vector<8xf32> to vector<8x1xf32>
    %cst_19 = arith.constant 1.000000e-24 : f32
    %43 = vector.broadcast %cst_19 : f32 to vector<8x1xf32>
    %44 = arith.maximumf %42, %43 : vector<8x1xf32>
    %45 = math.rsqrt %44 : vector<8x1xf32>
    %46 = vector.broadcast %45 : vector<8x1xf32> to vector<8x8xf32>
    %47 = arith.mulf %39, %46 : vector<8x8xf32>
    %48 = arith.mulf %18, %47 : vector<8x8xf32>
    %cst_20 = arith.constant dense<0.000000e+00> : vector<8xf32>
    %49 = vector.multi_reduction <add>, %48, %cst_20 [1] : vector<8x8xf32> to vector<8xf32>
    %50 = vector.shape_cast %49 : vector<8xf32> to vector<8x1xf32>
    %cst_21 = arith.constant 1.000000e+00 : f32
    %51 = vector.broadcast %cst_21 : f32 to vector<8x1xf32>
    %52 = arith.subf %51, %50 : vector<8x1xf32>
    %53 = vector.shape_cast %52 : vector<8x1xf32> to vector<1x8x1xf32>
    %cst_22 = arith.constant dense<0.000000e+00> : vector<1xf32>
    %54 = vector.multi_reduction <add>, %53, %cst_22 [1, 2] : vector<1x8x1xf32> to vector<1xf32>
    %55 = vector.shape_cast %54 : vector<1xf32> to vector<1x1x1xf32>
    %56 = vector.extract %55[0, 0, 0] : f32 from vector<1x1x1xf32>
    %cst_23 = arith.constant 8.000000e+00 : f32
    %57 = arith.divf %56, %cst_23 : f32
    %58 = arith.addf %38, %57 : f32
    %59 = vector.extract_strided_slice %8 {offsets = [0, 24], sizes = [8, 8], strides = [1, 1]} : vector<8x128xf32> to vector<8x8xf32>
    %60 = arith.mulf %59, %59 : vector<8x8xf32>
    %cst_24 = arith.constant dense<0.000000e+00> : vector<8xf32>
    %61 = vector.multi_reduction <add>, %60, %cst_24 [1] : vector<8x8xf32> to vector<8xf32>
    %62 = vector.shape_cast %61 : vector<8xf32> to vector<8x1xf32>
    %cst_25 = arith.constant 1.000000e-24 : f32
    %63 = vector.broadcast %cst_25 : f32 to vector<8x1xf32>
    %64 = arith.maximumf %62, %63 : vector<8x1xf32>
    %65 = math.rsqrt %64 : vector<8x1xf32>
    %66 = vector.broadcast %65 : vector<8x1xf32> to vector<8x8xf32>
    %67 = arith.mulf %59, %66 : vector<8x8xf32>
    %68 = arith.mulf %18, %67 : vector<8x8xf32>
    %cst_26 = arith.constant dense<0.000000e+00> : vector<8xf32>
    %69 = vector.multi_reduction <add>, %68, %cst_26 [1] : vector<8x8xf32> to vector<8xf32>
    %70 = vector.shape_cast %69 : vector<8xf32> to vector<8x1xf32>
    %cst_27 = arith.constant 1.000000e+00 : f32
    %71 = vector.broadcast %cst_27 : f32 to vector<8x1xf32>
    %72 = arith.subf %71, %70 : vector<8x1xf32>
    %73 = vector.shape_cast %72 : vector<8x1xf32> to vector<1x8x1xf32>
    %cst_28 = arith.constant dense<0.000000e+00> : vector<1xf32>
    %74 = vector.multi_reduction <add>, %73, %cst_28 [1, 2] : vector<1x8x1xf32> to vector<1xf32>
    %75 = vector.shape_cast %74 : vector<1xf32> to vector<1x1x1xf32>
    %76 = vector.extract %75[0, 0, 0] : f32 from vector<1x1x1xf32>
    %cst_29 = arith.constant 8.000000e+00 : f32
    %77 = arith.divf %76, %cst_29 : f32
    %78 = arith.addf %58, %77 : f32
    %cst_30 = arith.constant 3.000000e+00 : f32
    %79 = arith.divf %78, %cst_30 : f32
    %80 = arith.negf %4 : vector<8x1xf32>
    %81 = math.exp %80 : vector<8x1xf32>
    %cst_31 = arith.constant 1.000000e+00 : f32
    %82 = vector.broadcast %cst_31 : f32 to vector<8x1xf32>
    %83 = arith.addf %82, %81 : vector<8x1xf32>
    %84 = arith.divf %82, %83 : vector<8x1xf32>
    %85 = arith.mulf %84, %84 : vector<8x1xf32>
    %86 = vector.shape_cast %85 : vector<8x1xf32> to vector<1x8x1xf32>
    %cst_32 = arith.constant dense<0.000000e+00> : vector<1xf32>
    %87 = vector.multi_reduction <add>, %86, %cst_32 [1, 2] : vector<1x8x1xf32> to vector<1xf32>
    %88 = vector.shape_cast %87 : vector<1xf32> to vector<1x1x1xf32>
    %89 = vector.extract %88[0, 0, 0] : f32 from vector<1x1x1xf32>
    %cst_33 = arith.constant 8.000000e+00 : f32
    %90 = arith.divf %89, %cst_33 : f32
    %91 = vector.broadcast %79 : f32 to vector<1x1xf32>
    %c0_34 = arith.constant 0 : index
    %c32 = arith.constant 32 : index
    %92 = vector.load %arg3[%c0_34, %c32] : memref<8x128xf32, #tpu.memory_space<vmem>>, vector<1x1xf32>
    tpu.vector_store %arg3[%c0_34, %c32], %91 {strides = array<i32>} : memref<8x128xf32, #tpu.memory_space<vmem>>, vector<1x1xf32>,
    %93 = vector.broadcast %90 : f32 to vector<1x1xf32>
    %c0_35 = arith.constant 0 : index
    %c33 = arith.constant 33 : index
    %94 = vector.load %arg3[%c0_35, %c33] : memref<8x128xf32, #tpu.memory_space<vmem>>, vector<1x1xf32>
    tpu.vector_store %arg3[%c0_35, %c33], %93 {strides = array<i32>} : memref<8x128xf32, #tpu.memory_space<vmem>>, vector<1x1xf32>,
    return
  }
}

</mosaic_0001>

<bundles_post_ra>
// kernel: tpu_custom_call.1
= control target key start
LH: loop header
LB: loop body
LE: loop exit
PB: predicated region body
PF: predicated region fallthrough
CT: control target
= control target key end

     0   :  { %8 = vsyncpa [#allocation3], 0  ;;  %s681_s0 = inlined_call_operand.hbm [shape: f32[8,49], index: 0, kind: input, shape index: {}]   ;;  %s682_s1 = inlined_call_operand.hbm [shape: f32[49,130], index: 1, kind: input, shape index: {}]   ;;  %s683_s2 = inlined_call_operand.hbm [shape: f32[129,128], index: 2, kind: input, shape index: {}]   ;;  %s684_s3 = inlined_call_operand.hbm [shape: f32[8,128], index: 3, kind: output, shape index: {}]  }
   0x1   :  { %9 = vsyncpa [#allocation6], 0 }
   0x2   :  { %10 = vsyncpa [#allocation4], 0  ;;  %s572_s12 = smov [#allocation5]   ;;  %s478_s16 = scalar_lea.hbm %s682_s1, 1792 }
   0x3   :  { %s26_s13 = sshll.u32 %s572_s12, 4  ;;  %p479_p0 = scmp.ne.s32.totalorder %s682_s1, %s478_s16  ;;  %s27_s13 = int_to_ptr.vmem [resolvable:$true] %s26_s13 }
   0x4   :  { %p482_p1 = scmp.lt.u32.totalorder %s478_s16, %s682_s1 }
   0x6   :  { %p484_p2 = pnand %p482_p1, %p479_p0 }
   0x8   :  { %487 = shalt.err (!%p484_p2)
}
   0x9   :  { %s488_s21 = scalar_lea.vmem %s27_s13, 1792  ;;  %p493_p4 = scmp.lt.s32.totalorder %s27_s13, %s27_s13 }
   0xa   :  { %p489_p3 = scmp.ne.s32.totalorder %s27_s13, %s488_s21  ;;  %p494_p5 = scmp.lt.s32.totalorder %s488_s21, %s488_s21 }
   0xc   :  { %p495_p6 = por %p494_p5, %p493_p4 }
   0xe   :  { %p496_p7 = pnand %p495_p6, %p489_p3 }
  0x10   :  { %499 = shalt.err (!%p496_p7)
}
  0x11   :  { %s573_s22 = smov 256   ;;  %s574_s23 = smov 16  }
  0x12   :  { %32 = dma.hbm_to_vmem [thread:$0]  %s682_s1, 1792, %s27_s13, [#allocation6], %s573_s22, %s573_s22, %s574_s23  }
  0x13   :  { %s575_s26 = smov [#allocation2]   ;;  %s576_s28 = smov [#allocation7]  }
  0x14   :  { %s17_s27 = sshll.u32 %s575_s26, 4  ;;  %s38_s29 = sshll.u32 %s576_s28, 4  ;;  %s18_s27 = int_to_ptr.vmem [resolvable:$true] %s17_s27  ;;  %s39_s29 = int_to_ptr.vmem [resolvable:$true] %s38_s29 }
  0x15   :  { %s500_s5 = scalar_lea.hbm %s681_s0, 128 }
  0x16   :  { %p501_p8 = scmp.ne.s32.totalorder %s681_s0, %s500_s5  ;;  %p504_p9 = scmp.lt.u32.totalorder %s500_s5, %s681_s0 }
  0x18   :  { %p506_p10 = pnand %p504_p9, %p501_p8 }
  0x1a   :  { %509 = shalt.err (!%p506_p10)
}
  0x1b   :  { %s510_s1 = scalar_lea.vmem %s18_s27, 128  ;;  %p515_p12 = scmp.lt.s32.totalorder %s18_s27, %s18_s27 }
  0x1c   :  { %p511_p11 = scmp.ne.s32.totalorder %s18_s27, %s510_s1  ;;  %p516_p13 = scmp.lt.s32.totalorder %s510_s1, %s510_s1 }
  0x1e   :  { %p517_p0 = por %p516_p13, %p515_p12 }
  0x20   :  { %p518_p1 = pnand %p517_p0, %p511_p11 }
  0x22   :  { %521 = shalt.err (!%p518_p1)
}
  0x23   :  { %20 = dma.hbm_to_vmem [thread:$0]  %s681_s0, 128, %s18_s27, [#allocation3]  }
  0x24   :  { %s522_s14 = scalar_lea.hbm %s683_s2, 2176 }
  0x25   :  { %p523_p2 = scmp.ne.s32.totalorder %s683_s2, %s522_s14  ;;  %p526_p3 = scmp.lt.u32.totalorder %s522_s14, %s683_s2 }
  0x27   :  { %p528_p4 = pnand %p526_p3, %p523_p2 }
  0x29   :  { %531 = shalt.err (!%p528_p4)
}
  0x2a   :  { %s532_s19 = scalar_lea.vmem %s39_s29, 2176  ;;  %p537_p6 = scmp.lt.s32.totalorder %s39_s29, %s39_s29 }
  0x2b   :  { %p533_p5 = scmp.ne.s32.totalorder %s39_s29, %s532_s19  ;;  %p538_p7 = scmp.lt.s32.totalorder %s532_s19, %s532_s19 }
  0x2d   :  { %p539_p8 = por %p538_p7, %p537_p6 }
  0x2f   :  { %p540_p9 = pnand %p539_p8, %p533_p5 }
  0x31   :  { %543 = shalt.err (!%p540_p9)
}
  0x32   :  { %s577_s0 = smov 128   ;;  %s578_s20 = smov 8  }
  0x33   :  { %44 = dma.hbm_to_vmem [thread:$0]  %s683_s2, 2176, %s39_s29, [#allocation6], %s577_s0, %s577_s0, %s578_s20  }
  0x34   :  { %566 = dma.done.wait [#allocation3], 128  }
  0x35   :  { %567 = vsyncadd [#allocation3], 4294967168 }
  0x36   :  { %568 = dma.done.wait [#allocation6], 3968  }
  0x37   :  { %569 = vsyncadd [#allocation6], 4294963328  ;;  %v579_v0 = vmov 0.0   ;;  %v580_v1 = vmov 0.0|0.0   ;;  %v56_v2 = vld [vmem:[#allocation5 + $0x8] sm:$0xff]  ;;  %v58_v3 = vld [vmem:[#allocation5 + $0x18] sm:$0xff] }
  0x38   :  { %161 = vmatprep.mubr.f32.mxu0 %v579_v0  ;;  %420 = vmatprep.subr.bf16.mxu1 %v580_v1  ;;  %v55_v4 = vld [vmem:[#allocation5] sm:$0xff]  ;;  %v408_v5 = vpack.c.bf16 %v58_v3, %v56_v2  ;;  %v57_v6 = vld [vmem:[#allocation5 + $0x10] sm:$0xff]  ;;  %v60_v7 = vld [vmem:[#allocation5 + $0x28] sm:$0xff]  ;;  %vm90_vm0 = vcmask 1040384   ;;  %vm86_vm1 = vcmask 400384   ;;  %vm170_vm2 = vcmask 7168  }
  0x39   :  { %v62_v8 = vld [vmem:[#allocation5 + $0x38] sm:$0xff]  ;;  %v410_v9 = vpack.c.bf16 %v57_v6, %v55_v4  ;;  %v59_v11 = vld [vmem:[#allocation5 + $0x20] sm:$0xff]  ;;  %v61_v12 = vld [vmem:[#allocation5 + $0x30] sm:$0xff]  ;;  %s581_s2 = smov 104   ;;  %s582_s23 = smov 120   ;;  %vm249_vm3 = vcmask 64512  }
  0x3a   :  { %v412_v10 = vpack.c.bf16 %v62_v8, %v60_v7  ;;  %v64_v13 = vld [vmem:[#allocation5 + $0x48] sm:$0xff]  ;;  %409 = vmatprep.subr.bf16.mxu0 %v408_v5  ;;  %v66_v14 = vld [vmem:[#allocation5 + $0x58] sm:$0xff]  ;;  %v414_v15 = vpack.c.bf16 %v61_v12, %v59_v11  ;;  %v63_v16 = vld [vmem:[#allocation5 + $0x40] sm:$0xff]  ;;  %s583_s24 = smov 112   ;;  %s584_s25 = smov 127   ;;  %vm381_vm4 = vcmask 262400  }
  0x3b   :  { %411 = vmatpush1.bf16.msra.mxu0 %v410_v9  ;;  %v65_v17 = vld [vmem:[#allocation5 + $0x50] sm:$0xff]  ;;  %v416_v18 = vpack.c.bf16 %v66_v14, %v64_v13  ;;  %v70_v20 = vld [vmem:[#allocation7 + $0x8] sm:$0xff]  ;;  %v71_v21 = vld [vmem:[#allocation7 + $0x10] sm:$0xff]  ;;  %s585_s8 = smov [#allocation8]   ;;  %vm384_vm5 = vcmask 270600  }
  0x3c   :  { %413 = vmatprep.subr.bf16.mxu0 %v412_v10  ;;  %v69_v19 = vld [vmem:[#allocation7] sm:$0xff]  ;;  %v72_v23 = vld [vmem:[#allocation7 + $0x18] sm:$0xff]  ;;  %v418_v24 = vpack.c.bf16 %v65_v17, %v63_v16  ;;  %v74_v27 = vld [vmem:[#allocation7 + $0x28] sm:$0xff]  ;;  %s392_s9 = sshll.u32 %s585_s8, 4  ;;  %s393_s9 = int_to_ptr.vmem [resolvable:$true] %s392_s9 }
  0x3d   :  { %v421_v22 = vpack.c.bf16 %v70_v20, %v69_v19  ;;  %v424_v25 = vpack.c.bf16 %v72_v23, %v71_v21  ;;  %v73_v26 = vld [vmem:[#allocation7 + $0x20] sm:$0xff]  ;;  %v68_v28 = vld [vmem:[#allocation5 + $0x68] sm:$0x1]  ;;  %v67_v30 = vld [vmem:[#allocation5 + $0x60] sm:$0x1]  ;;  %s544_s11 = scalar_lea.vmem %s393_s9, 128  ;;  %p549_p11 = scmp.lt.s32.totalorder %s393_s9, %s393_s9 }
  0x3e   :  { %v427_v29 = vpack.c.bf16 %v74_v27, %v73_v26  ;;  %v75_v31 = vld [vmem:[#allocation7 + $0x30] sm:$0xff]  ;;  %v76_v32 = vld [vmem:[#allocation7 + $0x38] sm:$0xff]  ;;  %v54_v33 = vld [vmem:[#allocation2] sm:$0xff]  ;;  %p545_p10 = scmp.ne.s32.totalorder %s393_s9, %s544_s11  ;;  %p550_p12 = scmp.lt.s32.totalorder %s544_s11, %s544_s11 }
  0x3f   :  { %415 = vmatpush1.bf16.msra.mxu0 %v414_v15  ;;  %422 = vmatpush1.bf16.msra.mxu1 %v421_v22  ;;  %v430_v34 = vpack.c.bf16 %v76_v32, %v75_v31  ;;  %v77_v35 = vld [vmem:[#allocation7 + $0x40] sm:$0xff]  ;;  %v78_v36 = vld [vmem:[#allocation7 + $0x48] sm:$0xff]  ;;  %v79_v38 = vld [vmem:[#allocation7 + $0x50] sm:$0xff] }
  0x40   :  { %417 = vmatprep.subr.bf16.mxu0 %v416_v18  ;;  %423 = vmatprep.subr.bf16.mxu1 %v580_v1  ;;  %v433_v37 = vpack.c.bf16 %v78_v36, %v77_v35  ;;  %v80_v39 = vld [vmem:[#allocation7 + $0x58] sm:$0xff]  ;;  %v81_v41 = vld [vmem:[#allocation7 + $0x60] sm:$0xff]  ;;  %v82_v42 = vld [vmem:[#allocation7 + $0x68] sm:$0xff]  ;;  %p551_p13 = por %p550_p12, %p549_p11 }
  0x41   :  { %v436_v40 = vpack.c.bf16 %v80_v39, %v79_v38  ;;  %v439_v43 = vpack.c.bf16 %v82_v42, %v81_v41  ;;  %v83_v44 = vld [vmem:[#allocation7 + $0x70] sm:$0xff]  ;;  %v84_v45 = vld [vmem:[#allocation7 + $0x78] sm:$0xff]  ;;  %v85_v47 = vld [vmem:[#allocation7 + $0x80] sm:$0x1] }
  0x42   :  { %v442_v46 = vpack.c.bf16 %v84_v45, %v83_v44  ;;  %p552_p0 = pnand %p551_p13, %p545_p10 }
  0x43   :  { %419 = vmatpush1.bf16.msra.mxu0 %v418_v24  ;;  %425 = vmatpush1.bf16.msra.mxu1 %v424_v25 }
  0x44   :  { %402 = vmatprep.subr.msk.mxu0 %vm90_vm0, %v68_v28  ;;  %426 = vmatprep.subr.bf16.mxu1 %v580_v1 }
  0x47   :  { %403 = vmatpush1.msk.msra.mxu0 %vm90_vm0, %v67_v30  ;;  %428 = vmatpush1.bf16.msra.mxu1 %v427_v29 }
  0x48   :  { %404 = vmatmul.mubr.msk.f32.vlgmr.msra.gmra.mrb[0].mxu0 %vm86_vm1, %v54_v33  ;;  %429 = vmatprep.subr.bf16.mxu1 %v580_v1 }
  0x4b   :  { %431 = vmatpush1.bf16.msra.mxu1 %v430_v34 }
  0x4c   :  { %432 = vmatprep.subr.bf16.mxu1 %v580_v1 }
  0x4f   :  { %434 = vmatpush1.bf16.msra.mxu1 %v433_v37 }
  0x50   :  { %435 = vmatprep.subr.bf16.mxu1 %v580_v1 }
  0x53   :  { %437 = vmatpush1.bf16.msra.mxu1 %v436_v40 }
  0x54   :  { %438 = vmatprep.subr.bf16.mxu1 %v580_v1 }
  0x57   :  { %440 = vmatpush1.bf16.msra.mxu1 %v439_v43 }
  0x58   :  { %441 = vmatprep.subr.bf16.mxu1 %v580_v1 }
  0x5b   :  { %443 = vmatpush1.bf16.msra.mxu1 %v442_v46 }
  0x5c   :  { %209 = vmatprep.subr.mxu1 %v579_v0 }
  0x5f   :  { %405 = vmatpush1.msk.msra.mxu1 %vm90_vm0, %v85_v47 }
 0x11b   :  { %v163_v48 = vpop.f32.mrb[0].mxu0 }
 0x11c   :  { %v165_v49 = vpop.f32.mrb[1].mxu0  ;;  %v168_v51 = vmax.f32 %v163_v48, 0.0 }
 0x11d   :  { %v169_v50 = vmax.f32 %v165_v49, 0.0  ;;  %v407_v13 = vmul.f32 -1.442695, %v165_v49 }
 0x11f   :  { %406 = vmatprep.mubr.msk.f32.mxu1 %vm170_vm2, %v169_v50 }
 0x120   :  { %242 = vmatmul.mubr.f32.vlgmr.msra.gmra.mrb[0].mxu1 %v168_v51 }
 0x1f3   :  { %v243_v52 = vpop.f32.mrb[0].mxu1 }
 0x1f4   :  { %247 = vst [vmem:[#allocation8] sm:$0xff] %v243_v52  ;;  %v245_v53 = vpop.f32.mrb[1].mxu1  ;;  %v248_v54 = vmul.f32 %v243_v52, %v243_v52 }
 0x1f6   :  { %321 = vrot.lane.b32.xlu1 %v248_v54, %s581_s2  ;;  %257 = vrot.lane.b32.xlu0 %v248_v54, %s582_s23  ;;  %v250_v59 = vsel %vm249_vm3, %v248_v54, 0.0 }
 0x1fa   :  { %289 = vrot.lane.b32.xlu0 %v248_v54, %s583_s24 }
 0x268   :  { %v258_v55 = vpop.permute.xlu0 %257  ;;  %v322_v60 = vpop.permute.xlu1 %321 }
 0x269   :  { %v260_v56 = vsel %vm249_vm3, %v258_v55, 0.0  ;;  %v324_v61 = vsel %vm249_vm3, %v322_v60, 0.0 }
 0x26a   :  { %261 = vadd.xlane.f32.xlu1 %v260_v56 }
 0x26c   :  { %v290_v57 = vpop.permute.xlu0 %289 }
 0x26d   :  { %v292_v58 = vsel %vm249_vm3, %v290_v57, 0.0 }
 0x26e   :  { %293 = vadd.xlane.f32.xlu0 %v292_v58  ;;  %251 = vadd.xlane.f32.xlu1 %v250_v59 }
 0x272   :  { %325 = vadd.xlane.f32.xlu0 %v324_v61 }
 0x2f7   :  { %v262_v62 = vpop.xlane.xlu1 %261 }
 0x2f8   :  { %v263_v63 = vmax.f32 %v262_v62, 1e-24 }
 0x2fa   :  { %466 = vrsqrt.f32 %v263_v63 }
 0x2fb   :  { %v294_v0 = vpop.xlane.xlu0 %293  ;;  %v252_v10 = vpop.xlane.xlu1 %251 }
 0x2fc   :  { %v295_v1 = vmax.f32 %v294_v0, 1e-24  ;;  %v253_v11 = vmax.f32 %v252_v10, 1e-24 }
 0x2fe   :  { %468 = vrsqrt.f32 %v295_v1 }
 0x2ff   :  { %v326_v2 = vpop.xlane.xlu0 %325 }
 0x300   :  { %v327_v3 = vmax.f32 %v326_v2, 1e-24 }
 0x302   :  { %470 = vrsqrt.f32 %v327_v3 }
 0x303   :  { %472 = vrsqrt.f32 %v253_v11 }
 0x304   :  { %v467_v4 = vpop.eup %466  ;;  %474 = vpow2.f32 %v407_v13 }
 0x305   :  { %v265_v5 = vmul.f32 %v467_v4, %v243_v52 }
 0x307   :  { %267 = vrot.lane.b32.xlu0 %v265_v5, %s582_s23 }
 0x308   :  { %v469_v6 = vpop.eup %468 }
 0x309   :  { %v297_v7 = vmul.f32 %v469_v6, %v243_v52 }
 0x30b   :  { %299 = vrot.lane.b32.xlu1 %v297_v7, %s583_s24 }
 0x30c   :  { %v471_v8 = vpop.eup %470 }
 0x30d   :  { %v329_v9 = vmul.f32 %v471_v8, %v243_v52  ;;  %v473_v12 = vpop.eup %472 }
 0x30e   :  { %v255_v14 = vmul.f32 %v473_v12, %v243_v52  ;;  %v475_v24 = vpop.eup %474 }
 0x30f   :  { %331 = vrot.lane.b32.xlu1 %v329_v9, %s581_s2  ;;  %v359_v25 = vadd.f32 1.0, %v475_v24 }
 0x311   :  { %476 = vrcp.f32 %v359_v25 }
 0x31b   :  { %v477_v26 = vpop.eup %476 }
 0x31c   :  { %v362_v27 = vmul.f32 %v477_v26, %v477_v26 }
 0x379   :  { %v268_v15 = vpop.permute.xlu0 %267 }
 0x37a   :  { %v270_v16 = vmul.f32 %v268_v15, %v255_v14 }
 0x37c   :  { %v271_v17 = vsel %vm249_vm3, %v270_v16, 0.0 }
 0x37d   :  { %272 = vadd.xlane.f32.xlu0 %v271_v17  ;;  %v300_v18 = vpop.permute.xlu1 %299 }
 0x37e   :  { %v302_v19 = vmul.f32 %v300_v18, %v255_v14 }
 0x380   :  { %v303_v20 = vsel %vm249_vm3, %v302_v19, 0.0 }
 0x381   :  { %304 = vadd.xlane.f32.xlu1 %v303_v20  ;;  %v332_v21 = vpop.permute.xlu1 %331 }
 0x382   :  { %v334_v22 = vmul.f32 %v332_v21, %v255_v14 }
 0x384   :  { %v335_v23 = vsel %vm249_vm3, %v334_v22, 0.0 }
 0x385   :  { %336 = vadd.xlane.f32.xlu0 %v335_v23 }
 0x39b   :  { %364 = vrot.lane.b32.xlu0 %v362_v27, %s584_s25 }
 0x40a   :  { %v273_v28 = vpop.xlane.xlu0 %272 }
 0x40b   :  { %v274_v29 = vsub.f32 1.0, %v273_v28 }
 0x40d   :  { %v275_v30 = vsel %vm170_vm2, %v274_v29, 0.0 }
 0x40e   :  { %276 = vadd.xlane.f32.xlu1 %v275_v30  ;;  %v305_v31 = vpop.xlane.xlu1 %304 }
 0x40f   :  { %v306_v32 = vsub.f32 1.0, %v305_v31 }
 0x411   :  { %v307_v33 = vsel %vm170_vm2, %v306_v32, 0.0 }
 0x412   :  { %v337_v34 = vpop.xlane.xlu0 %336  ;;  %308 = vadd.xlane.f32.xlu1 %v307_v33 }
 0x413   :  { %v338_v35 = vsub.f32 1.0, %v337_v34 }
 0x415   :  { %v339_v36 = vsel %vm170_vm2, %v338_v35, 0.0 }
 0x416   :  { %v365_v37 = vpop.permute.xlu0 %364  ;;  %340 = vadd.xlane.f32.xlu1 %v339_v36 }
 0x417   :  { %v367_v38 = vsel %vm170_vm2, %v365_v37, 0.0 }
 0x41a   :  { %368 = vadd.xlane.f32.xlu1 %v367_v38 }
 0x49b   :  { %v277_v39 = vpop.xlane.xlu1 %276 }
 0x49c   :  { %v278_v40 = vrot.slane %v277_v39, 4 }
 0x49e   :  { %v279_v41 = vadd.f32 %v278_v40, %v277_v39 }
 0x49f   :  { %v309_v42 = vpop.xlane.xlu1 %308 }
 0x4a0   :  { %v280_v43 = vrot.slane %v279_v41, 2  ;;  %v310_v44 = vrot.slane %v309_v42, 4 }
 0x4a2   :  { %v311_v45 = vadd.f32 %v310_v44, %v309_v42  ;;  %v281_v46 = vadd.f32 %v280_v43, %v279_v41 }
 0x4a3   :  { %v341_v47 = vpop.xlane.xlu1 %340 }
 0x4a4   :  { %v312_v48 = vrot.slane %v311_v45, 2  ;;  %v342_v49 = vrot.slane %v341_v47, 4  ;;  %v282_v50 = vrot.slane %v281_v46, 1 }
 0x4a6   :  { %v343_v51 = vadd.f32 %v342_v49, %v341_v47  ;;  %v283_v52 = vadd.f32 %v282_v50, %v281_v46  ;;  %v313_v53 = vadd.f32 %v312_v48, %v311_v45 }
 0x4a7   :  { %v369_v54 = vpop.xlane.xlu1 %368 }
 0x4a8   :  { %v344_v55 = vrot.slane %v343_v51, 2  ;;  %v370_v56 = vrot.slane %v369_v54, 4  ;;  %444 = vpush %v283_v52  ;;  %v314_v57 = vrot.slane %v313_v53, 1 }
 0x4aa   :  { %v371_v58 = vadd.f32 %v370_v56, %v369_v54  ;;  %v315_v59 = vadd.f32 %v314_v57, %v313_v53  ;;  %v345_v60 = vadd.f32 %v344_v55, %v343_v51 }
 0x4ac   :  { %v372_v61 = vrot.slane %v371_v58, 2  ;;  %446 = vpush %v315_v59  ;;  %v346_v62 = vrot.slane %v345_v60, 1 }
 0x4ae   :  { %v373_v63 = vadd.f32 %v372_v61, %v371_v58  ;;  %v347_v0 = vadd.f32 %v346_v62, %v345_v60 }
 0x4b0   :  { %448 = vpush %v347_v0  ;;  %v374_v1 = vrot.slane %v373_v63, 1 }
 0x4b2   :  { %v375_v2 = vadd.f32 %v374_v1, %v373_v63 }
 0x4b4   :  { %450 = vpush %v375_v2 }
 0x4d9   :  { %s445_s26 = spop %444 }
 0x4da   :  { %s287_s29 = smul.f32 0.125, %s445_s26 }
 0x4dd   :  { %s447_s27 = spop %446 }
 0x4de   :  { %s319_s28 = smul.f32 0.125, %s447_s27 }
 0x4e0   :  { %s320_s4 = sadd.f32 %s319_s28, %s287_s29 }
 0x4e1   :  { %s449_s30 = spop %448 }
 0x4e2   :  { %s351_s5 = smul.f32 0.125, %s449_s30 }
 0x4e4   :  { %s352_s6 = sadd.f32 %s351_s5, %s320_s4 }
 0x4e5   :  { %s451_s7 = spop %450 }
 0x4e6   :  { %s355_s1 = smul.f32 0.33333334, %s352_s6 }
 0x4e7   :  { %s379_s10 = smul.f32 0.125, %s451_s7 }
 0x4e8   :  { %v380_v3 = vstv %s355_s1 }
 0x4e9   :  { %v383_v4 = vstv %s379_s10  ;;  %382 = vst.msk [vmem:[#allocation8] sm:$0x1] %vm381_vm4, %v380_v3 }
 0x4ea   :  { %385 = vst.msk [vmem:[#allocation8] sm:$0x1] %vm384_vm5, %v383_v4 }
 0x4eb   :  { %555 = shalt.err (!%p552_p0)
}
 0x4ec   :  { %s556_s14 = scalar_lea.hbm %s684_s3, 128 }
 0x4ed   :  { %p557_p1 = scmp.ne.s32.totalorder %s684_s3, %s556_s14  ;;  %p560_p2 = scmp.lt.u32.totalorder %s556_s14, %s684_s3 }
 0x4ef   :  { %p562_p3 = pnand %p560_p2, %p557_p1 }
 0x4f1   :  { %565 = shalt.err (!%p562_p3)
}
 0x4f2   :  { %395 = dma.vmem_to_hbm [thread:$0]  %s393_s9, 128, %s684_s3, [#allocation4]  }
 0x4f3   :  { %570 = dma.done.wait [#allocation4], 128  }
 0x4f4   :  { %571 = vsyncadd [#allocation4], 4294967168 }
 0x4f5   :  { %399 = vsyncpa [#allocation3], 1 }
 0x4f6   :  { %400 = vsyncpa [#allocation6], 1 }
 0x4f7   :  { %401 = vsyncpa [#allocation4], 1 }

</bundles_post_ra>
